<compile_context>
chip_gen: v5e
topology: v5e:2x2
jax: 0.10.0
libtpu: 0.0.40
codegen_flags: <defaults>
</compile_context>

<pallas_src>
import functools

import jax
import jax.numpy as jnp
from jax.experimental import pallas as pl
from jax.experimental.pallas import tpu as pltpu

LN_EPS = 1e-6          # onmt.modules.LayerNorm default
NEG_BIG = -1e30        # finite "-inf" used for padded vocab columns / running-max init


def _round_up(x, n):
    return (x + n - 1) // n * n


def _make_kernel(vocab_size, tile_v, mask_padded_cols, attn_scale):
    """Build the two-pass (online log-softmax) kernel for a fixed static config."""

    def kernel(x_ref, wa_ref, prm_ref, wt_ref, o_ref, normed_ref, m_ref, l_ref):
        # x_ref:      (tile_m, A)      f32   action rows (resident across p, j)
        # wa_ref:     (A, E)           f32   action_to_embed weight, transposed (in, out)
        # prm_ref:    (3, E)           f32   rows = [linear bias, ln gain a_2, ln bias b_2]
        # wt_ref:     (E, tile_v)      bf16  word-embedding matrix tile (transposed)
        # o_ref:      (tile_m, tile_v) f32   log-probability tile
        # normed_ref: (tile_m, E)      bf16  scratch: scaled LayerNorm output
        # m_ref,l_ref:(tile_m, 1)      f32   scratch: running max / running sum-exp
        p = pl.program_id(1)          # 0 = accumulate pass, 1 = finalize pass
        j = pl.program_id(2)          # vocab tile index

        @pl.when(jnp.logical_and(p == 0, j == 0))
        def _init():
            x = x_ref[...].astype(jnp.float32)
            prm = prm_ref[...].astype(jnp.float32)
            bias, gain, shift = prm[0:1, :], prm[1:2, :], prm[2:3, :]

            emb = jnp.dot(x, wa_ref[...], preferred_element_type=jnp.float32) + bias

            # classic onmt LayerNorm: a_2 * (x - mu) / (std + eps) + b_2, unbiased std
            e_dim = emb.shape[-1]
            mu = jnp.mean(emb, axis=-1, keepdims=True)
            centered = emb - mu
            var_unb = jnp.sum(centered * centered, axis=-1, keepdims=True) / (e_dim - 1)
            inv_std = pl.reciprocal(jnp.sqrt(var_unb) + LN_EPS)  # column recip, not E-wide divide
            normed = gain * (centered * inv_std) + shift

            # fold the attn/10 scale into the E-wide operand; cache as bf16 MXU input
            normed_ref[...] = (normed * attn_scale).astype(normed_ref.dtype)
            m_ref[...] = jnp.full(m_ref.shape, NEG_BIG, dtype=m_ref.dtype)
            l_ref[...] = jnp.zeros(l_ref.shape, dtype=l_ref.dtype)

        def _logits():
            a = jnp.dot(normed_ref[...], wt_ref[...], preferred_element_type=jnp.float32)
            if mask_padded_cols:
                col = j * tile_v + jax.lax.broadcasted_iota(jnp.int32, a.shape, 1)
                a = jnp.where(col < vocab_size, a, NEG_BIG)
            return a

        @pl.when(p == 0)
        def _accumulate():
            a = _logits()
            m_prev = m_ref[...]
            m_new = jnp.maximum(m_prev, jnp.max(a, axis=-1, keepdims=True))
            l_ref[...] = (jnp.exp(m_prev - m_new) * l_ref[...]
                          + jnp.sum(jnp.exp(a - m_new), axis=-1, keepdims=True))
            m_ref[...] = m_new

        @pl.when(p == 1)
        def _finalize():
            a = _logits()
            o_ref[...] = (a - m_ref[...] - jnp.log(l_ref[...])).astype(o_ref.dtype)

    return kernel


@functools.partial(jax.jit, static_argnames=("tile_m", "tile_v"))
def query_generator_forward(action, wa_t, ba, gamma, beta, word_matrix_t,
                            *, tile_m=None, tile_v=None):
    """action: (S, B, A) -> (S, B, V) log-probs."""
    seq_len, batch, action_dim = action.shape
    embed_dim, vocab_size = word_matrix_t.shape
    m = seq_len * batch

    # Large, MXU-filling row tile; pad M instead of requiring divisibility.
    if tile_m is None:
        tile_m = min(256, _round_up(m, 8))
    # Lane-dense vocab tile; sized so double-buffered (E,tile_v) bf16 + (tile_m,tile_v)
    # f32 blocks stay well inside v7x's 32 MiB scoped VMEM at production shapes.
    if tile_v is None:
        tile_v = min(2048, _round_up(vocab_size, 128))

    m_pad = _round_up(m, tile_m)
    v_pad = _round_up(vocab_size, tile_v)

    x = action.reshape(m, action_dim).astype(jnp.float32)
    if m_pad != m:
        x = jnp.pad(x, ((0, m_pad - m), (0, 0)))

    wt = word_matrix_t.astype(jnp.bfloat16)            # stream vocab weights in bf16
    if v_pad != vocab_size:
        wt = jnp.pad(wt, ((0, 0), (0, v_pad - vocab_size)))

    params = jnp.stack([ba, gamma, beta], axis=0).astype(jnp.float32)  # merged (3, E)

    grid = (m_pad // tile_m, 2, v_pad // tile_v)       # (row tiles, pass, vocab tiles)
    kernel = _make_kernel(vocab_size, tile_v, v_pad != vocab_size, 0.1)

    out = pl.pallas_call(
        kernel,
        out_shape=jax.ShapeDtypeStruct((m_pad, v_pad), jnp.float32),
        grid_spec=pltpu.PrefetchScalarGridSpec(
            num_scalar_prefetch=0,
            grid=grid,
            in_specs=[
                pl.BlockSpec((tile_m, action_dim), lambda i, p, j: (i, 0)),
                pl.BlockSpec((action_dim, embed_dim), lambda i, p, j: (0, 0)),
                pl.BlockSpec((3, embed_dim), lambda i, p, j: (0, 0)),
                pl.BlockSpec((embed_dim, tile_v), lambda i, p, j: (0, j)),
            ],
            # p==0: park on vocab tile 0 (never written during that pass; fully
            # overwritten at p==1, j==0 before any writeback); p==1: walk vocab tiles.
            out_specs=pl.BlockSpec((tile_m, tile_v), lambda i, p, j: (i, p * j)),
            scratch_shapes=[
                pltpu.VMEM((tile_m, embed_dim), jnp.bfloat16),   # scaled LayerNorm out
                pltpu.VMEM((tile_m, 1), jnp.float32),            # running max
                pltpu.VMEM((tile_m, 1), jnp.float32),            # running sum-exp
            ],
        ),
        compiler_params=pltpu.CompilerParams(
            dimension_semantics=("parallel", "arbitrary", "arbitrary"),
            vmem_limit_bytes=48 * 1024 * 1024,
        ),
    )(x, wa_t.astype(jnp.float32), params, wt)

    return out[:m, :vocab_size].reshape(seq_len, batch, vocab_size)


def _reference(action, wa_t, ba, gamma, beta, word_matrix_t):
    emb = jnp.einsum("sba,ae->sbe", action, wa_t) + ba
    mu = jnp.mean(emb, axis=-1, keepdims=True)
    c = emb - mu
    std = jnp.sqrt(jnp.sum(c * c, axis=-1, keepdims=True) / (emb.shape[-1] - 1))
    normed = gamma * c / (std + LN_EPS) + beta
    attn = jnp.einsum("sbe,ev->sbv", normed, word_matrix_t) / 10.0
    return jax.nn.log_softmax(attn, axis=-1)


if __name__ == "__main__":
    # small, module-consistent shapes
    seq_len, batch = 8, 2
    action_size = 16     # model_opt.action_size
    embed_dim = 32       # model_opt.tgt_word_vec_size
    vocab_size = 320     # deliberately not a multiple of 128 -> exercises vocab padding

    key = jax.random.PRNGKey(0)
    k_act, k_wa, k_ba, k_word = jax.random.split(key, 4)

    action = jax.random.normal(k_act, (seq_len, batch, action_size), dtype=jnp.float32)

    # action_to_embed: nn.Linear(action_size, embed_dim); stored transposed (in, out)
    wa_t = 0.1 * jax.random.normal(k_wa, (action_size, embed_dim), dtype=jnp.float32)
    ba = 0.1 * jax.random.normal(k_ba, (embed_dim,), dtype=jnp.float32)

    # onmt LayerNorm params: a_2 init ones, b_2 init zeros
    gamma = jnp.ones((embed_dim,), dtype=jnp.float32)
    beta = jnp.zeros((embed_dim,), dtype=jnp.float32)

    # dec_embed_layer.word_lut.weight: (vocab_size, embed_dim); stored transposed (E, V)
    word_matrix_t = 0.1 * jax.random.normal(k_word, (embed_dim, vocab_size), dtype=jnp.float32)

    ref = _reference(action, wa_t, ba, gamma, beta, word_matrix_t)

    # 1) default (auto) tiling: one big row tile, one vocab tile, masked vocab padding
    out = query_generator_forward(action, wa_t, ba, gamma, beta, word_matrix_t)
    out = jax.block_until_ready(out)
    assert out.shape == (seq_len, batch, vocab_size)
    assert jnp.allclose(out, ref, atol=2e-2, rtol=2e-2), "mismatch vs reference (auto tiles)"
    assert jnp.allclose(jnp.sum(jnp.exp(out), axis=-1), 1.0, atol=2e-2)

    # 2) forced small tiles: exercises multi-row-tile grid, multi-vocab-tile online
    #    logsumexp accumulation, and masking of padded vocab columns
    out2 = query_generator_forward(action, wa_t, ba, gamma, beta, word_matrix_t,
                                   tile_m=8, tile_v=128)
    out2 = jax.block_until_ready(out2)
    assert jnp.allclose(out2, ref, atol=2e-2, rtol=2e-2), "mismatch vs reference (tiled)"
    assert jnp.allclose(out2, out, atol=2e-2, rtol=2e-2)

    print("KERNEL_OK")
</pallas_src>

<mosaic_0001>
module attributes {stable_mosaic.version = 11 : i64} {
  func.func @kernel(%arg0: i32, %arg1: i32, %arg2: i32, %arg3: memref<16x16xf32, #tpu.memory_space<vmem>>, %arg4: memref<16x32xf32, #tpu.memory_space<vmem>>, %arg5: memref<3x32xf32, #tpu.memory_space<vmem>>, %arg6: memref<32x384xbf16, #tpu.memory_space<vmem>>, %arg7: memref<16x384xf32, #tpu.memory_space<vmem>>, %arg8: memref<16x32xbf16, #tpu.memory_space<vmem>>, %arg9: memref<16x1xf32, #tpu.memory_space<vmem>>, %arg10: memref<16x1xf32, #tpu.memory_space<vmem>>) attributes {dimension_semantics = [#tpu.dimension_semantics<parallel>, #tpu.dimension_semantics<arbitrary>, #tpu.dimension_semantics<arbitrary>], iteration_bounds = array<i64: 1, 2, 1>, scalar_prefetch = 0 : i64, scratch_operands = 3 : i64, tpu.core_type = #tpu.core_type<tc>, window_params = [{transform_indices = @transform_0, window_bounds = array<i64: 16, 16>}, {pipeline_mode = #tpu.pipeline_mode<synchronous>, transform_indices = @transform_1, window_bounds = array<i64: 16, 32>}, {pipeline_mode = #tpu.pipeline_mode<synchronous>, transform_indices = @transform_2, window_bounds = array<i64: 3, 32>}, {transform_indices = @transform_3, window_bounds = array<i64: 32, 384>}, {transform_indices = @transform_4, window_bounds = array<i64: 16, 384>}]} {
    %c0_i32 = arith.constant 0 : i32
    %0 = arith.cmpi eq, %arg1, %c0_i32 : i32
    %c0_i32_0 = arith.constant 0 : i32
    %1 = arith.cmpi eq, %arg2, %c0_i32_0 : i32
    %2 = arith.andi %0, %1 : i1
    %3 = arith.extui %2 : i1 to i32
    %c0_i32_1 = arith.constant 0 : i32
    %4 = arith.cmpi ne, %3, %c0_i32_1 : i32
    scf.if %4 {
      %c0 = arith.constant 0 : index
      %c0_5 = arith.constant 0 : index
      %11 = vector.load %arg3[%c0, %c0_5] : memref<16x16xf32, #tpu.memory_space<vmem>>, vector<16x16xf32>
      %c0_6 = arith.constant 0 : index
      %c0_7 = arith.constant 0 : index
      %12 = vector.load %arg5[%c0_6, %c0_7] : memref<3x32xf32, #tpu.memory_space<vmem>>, vector<3x32xf32>
      %13 = vector.extract_strided_slice %12 {offsets = [0, 0], sizes = [1, 32], strides = [1, 1]} : vector<3x32xf32> to vector<1x32xf32>
      %14 = vector.extract_strided_slice %12 {offsets = [1, 0], sizes = [1, 32], strides = [1, 1]} : vector<3x32xf32> to vector<1x32xf32>
      %15 = vector.extract_strided_slice %12 {offsets = [2, 0], sizes = [1, 32], strides = [1, 1]} : vector<3x32xf32> to vector<1x32xf32>
      %c0_8 = arith.constant 0 : index
      %c0_9 = arith.constant 0 : index
      %16 = vector.load %arg4[%c0_8, %c0_9] : memref<16x32xf32, #tpu.memory_space<vmem>>, vector<16x32xf32>
      %cst = arith.constant dense<0.000000e+00> : vector<16x32xf32>
      %17 = tpu.matmul %11, %16, %cst {dimension_numbers = #tpu.dot_dimension_numbers<[1], [0], [0], [1], [0, 0, 1, 1], [], []>} : vector<16x16xf32>, vector<16x32xf32>, vector<16x32xf32> -> vector<16x32xf32>
      %18 = vector.broadcast %13 : vector<1x32xf32> to vector<16x32xf32>
      %19 = arith.addf %17, %18 : vector<16x32xf32>
      %cst_10 = arith.constant dense<0.000000e+00> : vector<16xf32>
      %20 = vector.multi_reduction <add>, %19, %cst_10 [1] : vector<16x32xf32> to vector<16xf32>
      %21 = vector.shape_cast %20 : vector<16xf32> to vector<16x1xf32>
      %cst_11 = arith.constant 3.200000e+01 : f32
      %22 = vector.broadcast %cst_11 : f32 to vector<16x1xf32>
      %23 = arith.divf %21, %22 : vector<16x1xf32>
      %24 = vector.broadcast %23 : vector<16x1xf32> to vector<16x32xf32>
      %25 = arith.subf %19, %24 : vector<16x32xf32>
      %26 = arith.mulf %25, %25 : vector<16x32xf32>
      %cst_12 = arith.constant dense<0.000000e+00> : vector<16xf32>
      %27 = vector.multi_reduction <add>, %26, %cst_12 [1] : vector<16x32xf32> to vector<16xf32>
      %28 = vector.shape_cast %27 : vector<16xf32> to vector<16x1xf32>
      %cst_13 = arith.constant 3.100000e+01 : f32
      %29 = vector.broadcast %cst_13 : f32 to vector<16x1xf32>
      %30 = arith.divf %28, %29 : vector<16x1xf32>
      %31 = math.sqrt %30 : vector<16x1xf32>
      %cst_14 = arith.constant 9.99999997E-7 : f32
      %32 = vector.broadcast %cst_14 : f32 to vector<16x1xf32>
      %33 = arith.addf %31, %32 : vector<16x1xf32>
      %34 = tpu.reciprocal %33 : vector<16x1xf32> -> vector<16x1xf32>
      %35 = vector.broadcast %34 : vector<16x1xf32> to vector<16x32xf32>
      %36 = arith.mulf %25, %35 : vector<16x32xf32>
      %37 = vector.broadcast %14 : vector<1x32xf32> to vector<16x32xf32>
      %38 = arith.mulf %37, %36 : vector<16x32xf32>
      %39 = vector.broadcast %15 : vector<1x32xf32> to vector<16x32xf32>
      %40 = arith.addf %38, %39 : vector<16x32xf32>
      %cst_15 = arith.constant 1.000000e-01 : f32
      %41 = vector.broadcast %cst_15 : f32 to vector<16x32xf32>
      %42 = arith.mulf %40, %41 : vector<16x32xf32>
      %43 = arith.truncf %42 : vector<16x32xf32> to vector<16x32xbf16>
      %c0_16 = arith.constant 0 : index
      %c0_17 = arith.constant 0 : index
      %44 = vector.load %arg8[%c0_16, %c0_17] : memref<16x32xbf16, #tpu.memory_space<vmem>>, vector<16x32xbf16>
      tpu.vector_store %arg8[%c0_16, %c0_17], %43 {strides = array<i32>} : memref<16x32xbf16, #tpu.memory_space<vmem>>, vector<16x32xbf16>,
      %cst_18 = arith.constant -1.000000e+30 : f32
      %45 = vector.broadcast %cst_18 : f32 to vector<16x1xf32>
      %c0_19 = arith.constant 0 : index
      %c0_20 = arith.constant 0 : index
      %46 = vector.load %arg9[%c0_19, %c0_20] : memref<16x1xf32, #tpu.memory_space<vmem>>, vector<16x1xf32>
      tpu.vector_store %arg9[%c0_19, %c0_20], %45 {strides = array<i32>} : memref<16x1xf32, #tpu.memory_space<vmem>>, vector<16x1xf32>,
      %cst_21 = arith.constant 0.000000e+00 : f32
      %47 = vector.broadcast %cst_21 : f32 to vector<16x1xf32>
      %c0_22 = arith.constant 0 : index
      %c0_23 = arith.constant 0 : index
      %48 = vector.load %arg10[%c0_22, %c0_23] : memref<16x1xf32, #tpu.memory_space<vmem>>, vector<16x1xf32>
      tpu.vector_store %arg10[%c0_22, %c0_23], %47 {strides = array<i32>} : memref<16x1xf32, #tpu.memory_space<vmem>>, vector<16x1xf32>,
    } else {
    }
    %c0_i32_2 = arith.constant 0 : i32
    %5 = arith.cmpi eq, %arg1, %c0_i32_2 : i32
    %6 = arith.extui %5 : i1 to i32
    %c0_i32_3 = arith.constant 0 : i32
    %7 = arith.cmpi ne, %6, %c0_i32_3 : i32
    scf.if %7 {
      %c0 = arith.constant 0 : index
      %c0_5 = arith.constant 0 : index
      %11 = vector.load %arg8[%c0, %c0_5] : memref<16x32xbf16, #tpu.memory_space<vmem>>, vector<16x32xbf16>
      %c0_6 = arith.constant 0 : index
      %c0_7 = arith.constant 0 : index
      %12 = vector.load %arg6[%c0_6, %c0_7] : memref<32x384xbf16, #tpu.memory_space<vmem>>, vector<32x384xbf16>
      %cst = arith.constant dense<0.000000e+00> : vector<16x384xf32>
      %13 = tpu.matmul %11, %12, %cst {dimension_numbers = #tpu.dot_dimension_numbers<[1], [0], [0], [1], [0, 0, 1, 1], [], []>} : vector<16x32xbf16>, vector<32x384xbf16>, vector<16x384xf32> -> vector<16x384xf32>
      %c384_i32 = arith.constant 384 : i32
      %14 = arith.muli %arg2, %c384_i32 : i32
      %15 = tpu.iota {dimensions = array<i32: 1>} : vector<16x384xi32>
      %16 = vector.broadcast %14 : i32 to vector<16x384xi32>
      %17 = arith.addi %16, %15 : vector<16x384xi32>
      %c320_i32 = arith.constant 320 : i32
      %18 = vector.broadcast %c320_i32 : i32 to vector<16x384xi32>
      %19 = arith.cmpi slt, %17, %18 : vector<16x384xi32>
      %cst_8 = arith.constant -1.000000e+30 : f32
      %20 = vector.broadcast %cst_8 : f32 to vector<16x384xf32>
      %21 = arith.select %19, %13, %20 : vector<16x384xi1>, vector<16x384xf32>
      %c0_9 = arith.constant 0 : index
      %c0_10 = arith.constant 0 : index
      %22 = vector.load %arg9[%c0_9, %c0_10] : memref<16x1xf32, #tpu.memory_space<vmem>>, vector<16x1xf32>
      %cst_11 = arith.constant dense<0xFF800000> : vector<16xf32>
      %23 = vector.multi_reduction <maximumf>, %21, %cst_11 [1] : vector<16x384xf32> to vector<16xf32>
      %24 = vector.shape_cast %23 : vector<16xf32> to vector<16x1xf32>
      %25 = arith.maximumf %22, %24 : vector<16x1xf32>
      %26 = arith.subf %22, %25 : vector<16x1xf32>
      %27 = math.exp %26 : vector<16x1xf32>
      %c0_12 = arith.constant 0 : index
      %c0_13 = arith.constant 0 : index
      %28 = vector.load %arg10[%c0_12, %c0_13] : memref<16x1xf32, #tpu.memory_space<vmem>>, vector<16x1xf32>
      %29 = arith.mulf %27, %28 : vector<16x1xf32>
      %30 = vector.broadcast %25 : vector<16x1xf32> to vector<16x384xf32>
      %31 = arith.subf %21, %30 : vector<16x384xf32>
      %32 = math.exp %31 : vector<16x384xf32>
      %cst_14 = arith.constant dense<0.000000e+00> : vector<16xf32>
      %33 = vector.multi_reduction <add>, %32, %cst_14 [1] : vector<16x384xf32> to vector<16xf32>
      %34 = vector.shape_cast %33 : vector<16xf32> to vector<16x1xf32>
      %35 = arith.addf %29, %34 : vector<16x1xf32>
      %c0_15 = arith.constant 0 : index
      %c0_16 = arith.constant 0 : index
      %36 = vector.load %arg10[%c0_15, %c0_16] : memref<16x1xf32, #tpu.memory_space<vmem>>, vector<16x1xf32>
      tpu.vector_store %arg10[%c0_15, %c0_16], %35 {strides = array<i32>} : memref<16x1xf32, #tpu.memory_space<vmem>>, vector<16x1xf32>,
      %c0_17 = arith.constant 0 : index
      %c0_18 = arith.constant 0 : index
      %37 = vector.load %arg9[%c0_17, %c0_18] : memref<16x1xf32, #tpu.memory_space<vmem>>, vector<16x1xf32>
      tpu.vector_store %arg9[%c0_17, %c0_18], %25 {strides = array<i32>} : memref<16x1xf32, #tpu.memory_space<vmem>>, vector<16x1xf32>,
    } else {
    }
    %c1_i32 = arith.constant 1 : i32
    %8 = arith.cmpi eq, %arg1, %c1_i32 : i32
    %9 = arith.extui %8 : i1 to i32
    %c0_i32_4 = arith.constant 0 : i32
    %10 = arith.cmpi ne, %9, %c0_i32_4 : i32
    scf.if %10 {
      %c0 = arith.constant 0 : index
      %c0_5 = arith.constant 0 : index
      %11 = vector.load %arg8[%c0, %c0_5] : memref<16x32xbf16, #tpu.memory_space<vmem>>, vector<16x32xbf16>
      %c0_6 = arith.constant 0 : index
      %c0_7 = arith.constant 0 : index
      %12 = vector.load %arg6[%c0_6, %c0_7] : memref<32x384xbf16, #tpu.memory_space<vmem>>, vector<32x384xbf16>
      %cst = arith.constant dense<0.000000e+00> : vector<16x384xf32>
      %13 = tpu.matmul %11, %12, %cst {dimension_numbers = #tpu.dot_dimension_numbers<[1], [0], [0], [1], [0, 0, 1, 1], [], []>} : vector<16x32xbf16>, vector<32x384xbf16>, vector<16x384xf32> -> vector<16x384xf32>
      %c384_i32 = arith.constant 384 : i32
      %14 = arith.muli %arg2, %c384_i32 : i32
      %15 = tpu.iota {dimensions = array<i32: 1>} : vector<16x384xi32>
      %16 = vector.broadcast %14 : i32 to vector<16x384xi32>
      %17 = arith.addi %16, %15 : vector<16x384xi32>
      %c320_i32 = arith.constant 320 : i32
      %18 = vector.broadcast %c320_i32 : i32 to vector<16x384xi32>
      %19 = arith.cmpi slt, %17, %18 : vector<16x384xi32>
      %cst_8 = arith.constant -1.000000e+30 : f32
      %20 = vector.broadcast %cst_8 : f32 to vector<16x384xf32>
      %21 = arith.select %19, %13, %20 : vector<16x384xi1>, vector<16x384xf32>
      %c0_9 = arith.constant 0 : index
      %c0_10 = arith.constant 0 : index
      %22 = vector.load %arg9[%c0_9, %c0_10] : memref<16x1xf32, #tpu.memory_space<vmem>>, vector<16x1xf32>
      %23 = vector.broadcast %22 : vector<16x1xf32> to vector<16x384xf32>
      %24 = arith.subf %21, %23 : vector<16x384xf32>
      %c0_11 = arith.constant 0 : index
      %c0_12 = arith.constant 0 : index
      %25 = vector.load %arg10[%c0_11, %c0_12] : memref<16x1xf32, #tpu.memory_space<vmem>>, vector<16x1xf32>
      %26 = math.log %25 : vector<16x1xf32>
      %27 = vector.broadcast %26 : vector<16x1xf32> to vector<16x384xf32>
      %28 = arith.subf %24, %27 : vector<16x384xf32>
      %c0_13 = arith.constant 0 : index
      %c0_14 = arith.constant 0 : index
      %29 = vector.load %arg7[%c0_13, %c0_14] : memref<16x384xf32, #tpu.memory_space<vmem>>, vector<16x384xf32>
      tpu.vector_store %arg7[%c0_13, %c0_14], %28 {strides = array<i32>} : memref<16x384xf32, #tpu.memory_space<vmem>>, vector<16x384xf32>,
    } else {
    }
    return
  }
  func.func @transform_0(%arg0: i32, %arg1: i32, %arg2: i32) -> (i32, i32) {
    %c0_i32 = arith.constant 0 : i32
    %c0_i32_0 = arith.constant 0 : i32
    return %arg0, %c0_i32 : i32, i32
  }
  func.func @transform_1(%arg0: i32, %arg1: i32, %arg2: i32) -> (i32, i32) {
    %c0_i32 = arith.constant 0 : i32
    %c0_i32_0 = arith.constant 0 : i32
    %c0_i32_1 = arith.constant 0 : i32
    return %c0_i32, %c0_i32_0 : i32, i32
  }
  func.func @transform_2(%arg0: i32, %arg1: i32, %arg2: i32) -> (i32, i32) {
    %c0_i32 = arith.constant 0 : i32
    %c0_i32_0 = arith.constant 0 : i32
    %c0_i32_1 = arith.constant 0 : i32
    return %c0_i32, %c0_i32_0 : i32, i32
  }
  func.func @transform_3(%arg0: i32, %arg1: i32, %arg2: i32) -> (i32, i32) {
    %c0_i32 = arith.constant 0 : i32
    %c0_i32_0 = arith.constant 0 : i32
    return %c0_i32, %arg2 : i32, i32
  }
  func.func @transform_4(%arg0: i32, %arg1: i32, %arg2: i32) -> (i32, i32) {
    %0 = arith.muli %arg1, %arg2 : i32
    %c0_i32 = arith.constant 0 : i32
    return %arg0, %0 : i32, i32
  }
}

</mosaic_0001>

<bundles_post_ra>
// kernel: query_generator_forward.1
= control target key start
LH: loop header
LB: loop body
LE: loop exit
PB: predicated region body
PF: predicated region fallthrough
CT: control target
= control target key end

     0   :  { %s1075_s15 = smov 0   ;;  %s1077_s16 = smov 0   ;;  %s1237_s0 = inlined_call_operand.vmem [shape: f32[16,16], index: 0, kind: input, shape index: {}]   ;;  %s1238_s1 = inlined_call_operand.vmem [shape: f32[16,32], index: 1, kind: input, shape index: {}]   ;;  %s1239_s2 = inlined_call_operand.vmem [shape: f32[3,32], index: 2, kind: input, shape index: {}]   ;;  %s1240_s3 = inlined_call_operand.vmem [shape: bf16[32,384], index: 3, kind: input, shape index: {}]   ;;  %s1241_s4 = inlined_call_operand.vmem [shape: f32[16,384], index: 4, kind: output, shape index: {}]  }
   0x1   :  { %s1079_s17 = smov 0  }
   0x2 LB: > { %s29_s18 = sadd.s32 1, %s1038_s16  ;;  %p865_p0 = scmp.ge.s32.totalorder %s1042_s17, 1  ;;  %s1042_s17 = sphi %s1079_s17, %s14_s17   ;;  %s1038_s16 = sphi %s1077_s16, %s1243_s16   ;;  %s1034_s15 = sphi %s1075_s15, %s1242_s15  }
   0x3   : > { %p31_p1 = scmp.ge.s32.totalorder %s29_s18, 2  ;;  %p197_p2 = scmp.lt.s32.totalorder %s1042_s17, 3 }
   0x5   : > { %s1245_s18 = smov (%p31_p1, %s29_s18), 0  ;;  %p198_p3 = pnand %p865_p0, %p197_p2 }
   0x6   : > { %p261_p4 = scmp.eq.s32.totalorder (!%p198_p3), %s1034_s15, 0 }
   0x7   : > { %201 = sbr.rel (%p198_p3) target bundleno = 1140 (0x474), region = 36 }
   0xc   : > { %266 = sbr.rel (!%p261_p4) target bundleno = 445 (0x1bd), region = 40  ;;  %v271_v0 = vld [vmem:[%s1238_s1 + $0x8] sm:$0xff] (%p261_p4)  ;;  %v270_v1 = vld [vmem:[%s1238_s1] sm:$0xff] (%p261_p4)  ;;  %vm273_vm0 = vcmask (%p261_p4), 130048   ;;  %vm303_vm1 = vcmask (%p261_p4), 261120   ;;  %v1044_v12 = vmov (%p261_p4), 32.0  }
   0xd   : > { %294 = vmatpush.msra.mxu0 (%p261_p4), %v271_v0  ;;  %v267_v2 = vld [vmem:[%s1237_s0] sm:$0xff] (%p261_p4)  ;;  %952 = vmatpush.msra.mxu1 (%p261_p4), %v271_v0  ;;  %v268_v3 = vld [vmem:[%s1237_s0 + $0x8] sm:$0xff] (%p261_p4)  ;;  %984 = vrcp.f32 (%p261_p4), %v1044_v12  ;;  %v1045_v29 = vmov (%p261_p4), 31.0   ;;  %vm407_vm7 = vcmask (%p261_p4), 7168   ;;  %v1046_v60 = vmov (%p261_p4), -1e+30  }
   0xe   : > { %v1111_v4 = vld [vmem:[%s1239_s2] sm:$0x7] (%p261_p4)  ;;  %986 = vrcp.f32 (%p261_p4), %v1045_v29  ;;  %408 = vst.msk [vmem:[#allocation3] sm:$0xff] (%p261_p4), %vm407_vm7, %v1046_v60 }
   0xf   : > { %295 = vmatpush.msra.mxu0 (%p261_p4), %v270_v1  ;;  %953 = vmatpush.msra.mxu1 (%p261_p4), %v270_v1  ;;  %v272_v5 = vperm.slane (%p261_p4), %v1111_v4, 0  ;;  %409 = vst.msk [vmem:[#allocation3 + $0x8] sm:$0xff] (%p261_p4), %vm407_vm7, %v1046_v60  ;;  %v1047_v1 = vmov (%p261_p4), 0.0  }
  0x10   : > { %867 = vmatmul.msk.f32.vlgmr.msra.gmra.mxu0 (%p261_p4), %vm273_vm0, %v267_v2  ;;  %868 = vmatmul.msk.f32.vlgmr.msra.gmra.mxu1 (%p261_p4), %vm273_vm0, %v268_v3  ;;  %410 = vst.msk [vmem:[#allocation4] sm:$0xff] (%p261_p4), %vm407_vm7, %v1047_v1  ;;  %vm404_vm0 = vcmask (%p261_p4), 257024  }
  0x11   : > { %411 = vst.msk [vmem:[#allocation4 + $0x8] sm:$0xff] %vm407_vm7, %v1047_v1 }
  0x13   : > { %v985_v13 = vpop.eup %984 }
  0x14   : > { %v311_v14 = vmul.f32 32.0, %v985_v13  ;;  %vm315_vm2 = vweird.f32 %v985_v13  ;;  %v987_v30 = vpop.eup %986 }
  0x15   : > { %v330_v31 = vmul.f32 31.0, %v987_v30  ;;  %vm334_vm3 = vweird.f32 %v987_v30 }
  0x16   : > { %v312_v15 = vsub.f32 1.0, %v311_v14  ;;  %v397_v14 = vperm.slane %v1111_v4, 2 }
  0x17   : > { %v331_v32 = vsub.f32 1.0, %v330_v31 }
  0x18   : > { %v313_v16 = vmul.f32 %v985_v13, %v312_v15 }
  0x19   : > { %v332_v33 = vmul.f32 %v987_v30, %v331_v32 }
  0x1a   : > { %v314_v17 = vadd.f32 %v985_v13, %v313_v16 }
  0x1b   : > { %v333_v34 = vadd.f32 %v987_v30, %v332_v33 }
  0x1c   : > { %v316_v18 = vsel %vm315_vm2, %v985_v13, %v314_v17 }
  0x1d   : > { %v335_v35 = vsel %vm334_vm3, %v987_v30, %v333_v34 }
  0x8d   : > { %v297_v6 = vpop.f32.mrf.mxu0  ;;  %v300_v8 = vpop.f32.mrf.mxu1 }
  0x8e   : > { %v298_v7 = vadd.f32 %v297_v6, %v272_v5  ;;  %v301_v10 = vadd.f32 %v300_v8, %v272_v5 }
  0x90   : > { %v304_v9 = vsel %vm303_vm1, %v298_v7, 0.0  ;;  %v307_v11 = vsel %vm303_vm1, %v301_v10, 0.0 }
  0x91   : > { %305 = vadd.xlane.f32.xlu0 %v304_v9 }
  0x99   : > { %308 = vadd.xlane.f32.xlu0 %v307_v11 }
 0x104   : > { %v306_v19 = vpop.xlane.xlu0 %305 }
 0x105   : > { %v317_v20 = vmul.f32 %v316_v18, %v306_v19 }
 0x107   : > { %v1116_v21 = vsub.f32 %v298_v7, %v317_v20 }
 0x109   : > { %v321_v22 = vmul.f32 %v1116_v21, %v1116_v21 }
 0x10b   : > { %v323_v23 = vsel %vm303_vm1, %v321_v22, 0.0 }
 0x10c   : > { %324 = vadd.xlane.f32.xlu1 %v323_v23  ;;  %v309_v24 = vpop.xlane.xlu0 %308 }
 0x10d   : > { %v318_v25 = vmul.f32 %v316_v18, %v309_v24 }
 0x10f   : > { %v1121_v26 = vsub.f32 %v301_v10, %v318_v25  ;;  %v394_v10 = vperm.slane %v1111_v4, 1 }
 0x111   : > { %v322_v27 = vmul.f32 %v1121_v26, %v1121_v26 }
 0x113   : > { %v326_v28 = vsel %vm303_vm1, %v322_v27, 0.0 }
 0x114   : > { %327 = vadd.xlane.f32.xlu1 %v326_v28 }
 0x17f   : > { %v325_v36 = vpop.xlane.xlu1 %324 }
 0x180   : > { %v336_v37 = vmul.f32 %v335_v35, %v325_v36 }
 0x182   : > { %988 = vrsqrt.f32 %v336_v37  ;;  %vm345_vm4 = vcmp.eq.f32.partialorder %v336_v37, inf  ;;  %v348_v50 = vand.u32 2147483648, %v336_v37  ;;  %vm347_vm5 = vcmp.eq.f32.partialorder %v336_v37, 0.0 }
 0x187   : > { %v328_v38 = vpop.xlane.xlu1 %327 }
 0x188   : > { %v989_v39 = vpop.eup %988  ;;  %v337_v40 = vmul.f32 %v335_v35, %v328_v38 }
 0x189   : > { %v339_v41 = vmul.f32 %v989_v39, %v336_v37 }
 0x18a   : > { %990 = vrsqrt.f32 %v337_v40  ;;  %vm357_vm6 = vcmp.eq.f32.partialorder %v337_v40, inf  ;;  %v360_v58 = vand.u32 2147483648, %v337_v40  ;;  %vm359_vm8 = vcmp.eq.f32.partialorder %v337_v40, 0.0 }
 0x18b   : > { %v340_v42 = vmul.f32 %v989_v39, %v339_v41 }
 0x18d   : > { %v341_v43 = vmul.f32 0.5, %v340_v42 }
 0x18f   : > { %v342_v44 = vsub.f32 1.5, %v341_v43 }
 0x190   : > { %v991_v45 = vpop.eup %990 }
 0x191   : > { %v343_v46 = vmul.f32 %v989_v39, %v342_v44  ;;  %v351_v47 = vmul.f32 %v991_v45, %v337_v40 }
 0x193   : > { %v344_v48 = vmul.f32 %v343_v46, %v336_v37  ;;  %v352_v49 = vmul.f32 %v991_v45, %v351_v47 }
 0x195   : > { %v346_v51 = vsel %vm345_vm4, %v336_v37, %v344_v48  ;;  %v353_v52 = vmul.f32 0.5, %v352_v49 }
 0x196   : > { %v349_v53 = vsel %vm347_vm5, %v348_v50, %v346_v51 }
 0x197   : > { %v362_v54 = vadd.f32 1e-06, %v349_v53  ;;  %v354_v55 = vsub.f32 1.5, %v353_v52 }
 0x199   : > { %992 = vrcp.f32 %v362_v54  ;;  %v355_v56 = vmul.f32 %v991_v45, %v354_v55  ;;  %v375_v3 = vand.u32 2147483648, %v362_v54  ;;  %v373_v6 = vand.u32 2147483647, %v362_v54 }
 0x19a   : > { %vm369_vm10 = vweird.f32 %v362_v54 }
 0x19b   : > { %v356_v57 = vmul.f32 %v355_v56, %v337_v40  ;;  %v376_v8 = vor.u32 1.1754944e-38, %v375_v3  ;;  %vm374_vm12 = vcmp.eq.f32.partialorder %v373_v6, 8.507059e+37 }
 0x19d   : > { %v358_v59 = vsel %vm357_vm6, %v337_v40, %v356_v57 }
 0x19e   : > { %v361_v62 = vsel %vm359_vm8, %v360_v58, %v358_v59 }
 0x19f   : > { %v993_v61 = vpop.eup %992  ;;  %v363_v0 = vadd.f32 1e-06, %v361_v62 }
 0x1a0   : > { %v365_v63 = vmul.f32 %v993_v61, %v362_v54  ;;  %vm370_vm9 = vweird.f32 %v993_v61 }
 0x1a1   : > { %994 = vrcp.f32 %v363_v0  ;;  %vm371_vm11 = vmor %vm369_vm10, %vm370_vm9  ;;  %v389_v18 = vand.u32 2147483648, %v363_v0  ;;  %v387_v20 = vand.u32 2147483647, %v363_v0  ;;  %vm383_vm14 = vweird.f32 %v363_v0 }
 0x1a2   : > { %v366_v2 = vsub.f32 1.0, %v365_v63 }
 0x1a3   : > { %v390_v25 = vor.u32 1.1754944e-38, %v389_v18  ;;  %vm388_vm1 = vcmp.eq.f32.partialorder %v387_v20, 8.507059e+37 }
 0x1a4   : > { %v367_v5 = vmul.f32 %v993_v61, %v366_v2 }
 0x1a6   : > { %v368_v7 = vadd.f32 %v993_v61, %v367_v5 }
 0x1a7   : > { %v995_v9 = vpop.eup %994 }
 0x1a8   : > { %v372_v11 = vsel %vm371_vm11, %v993_v61, %v368_v7  ;;  %v379_v13 = vmul.f32 %v995_v9, %v363_v0  ;;  %vm384_vm13 = vweird.f32 %v995_v9 }
 0x1a9   : > { %v377_v12 = vsel %vm374_vm12, %v376_v8, %v372_v11  ;;  %vm385_vm15 = vmor %vm383_vm14, %vm384_vm13 }
 0x1aa   : > { %v392_v15 = vmul.f32 %v377_v12, %v1116_v21  ;;  %v380_v16 = vsub.f32 1.0, %v379_v13 }
 0x1ac   : > { %v395_v17 = vmul.f32 %v394_v10, %v392_v15  ;;  %v381_v19 = vmul.f32 %v995_v9, %v380_v16 }
 0x1ae   : > { %v398_v22 = vadd.f32 %v397_v14, %v395_v17  ;;  %v382_v23 = vadd.f32 %v995_v9, %v381_v19 }
 0x1b0   : > { %v400_v24 = vmul.f32 0.1, %v398_v22  ;;  %v386_v27 = vsel %vm385_vm15, %v995_v9, %v382_v23 }
 0x1b1   : > { %v391_v29 = vsel %vm388_vm1, %v390_v25, %v386_v27 }
 0x1b2   : > { %v402_v28 = vpack.c.bf16 %v400_v24, %v400_v24  ;;  %v393_v4 = vmul.f32 %v391_v29, %v1121_v26 }
 0x1b4   : > { %405 = vst.msk [vmem:[#allocation2] sm:$0xf] %vm404_vm0, %v402_v28  ;;  %v396_v21 = vmul.f32 %v394_v10, %v393_v4 }
 0x1b6   : > { %v399_v30 = vadd.f32 %v397_v14, %v396_v21 }
 0x1b8   : > { %v401_v31 = vmul.f32 0.1, %v399_v30 }
 0x1ba   : > { %v403_v32 = vpack.c.bf16 %v401_v31, %v401_v31 }
 0x1bc   : > { %406 = vst.msk [vmem:[#allocation2 + $0x4] sm:$0xf] %vm404_vm0, %v403_v32 }
 0x1bd PF: > { %p869_p5 = scmp.ne.s32.totalorder %s1034_s15, 0 }
 0x1bf   : > { %414 = sbr.rel (%p869_p5) target bundleno = 976 (0x3d0), region = 44 }
 0x1c4   : > { %v888_v33 = vld [vmem:[%s1240_s3 + $0x18] sm:$0xf]  ;;  %v943_v34 = vld [vmem:[%s1240_s3 + $0x20] sm:$0xf0]  ;;  %v896_v26 = vld [vmem:[%s1240_s3 + $0x20] sm:$0xf]  ;;  %v509_v51 = vlaneseq }
 0x1c5   : > { %v889_v35 = vor.u32 %v943_v34, %v888_v33  ;;  %v944_v36 = vld [vmem:[%s1240_s3 + $0x28] sm:$0xf0]  ;;  %v942_v37 = vld [vmem:[%s1240_s3 + $0x1c] sm:$0xf]  ;;  %v890_v38 = vld [vmem:[%s1240_s3 + $0x24] sm:$0xf0] }
 0x1c6   : > { %v897_v39 = vor.u32 %v944_v36, %v896_v26  ;;  %v893_v40 = vor.u32 %v942_v37, %v890_v38  ;;  %v876_v41 = vld [vmem:[%s1240_s3] sm:$0xf]  ;;  %v940_v42 = vld [vmem:[%s1240_s3 + $0x8] sm:$0xf0]  ;;  %v884_v43 = vld [vmem:[%s1240_s3 + $0x8] sm:$0xf] }
 0x1c7   : > { %472 = vmatpush.bf16.msra.mxu0 %v889_v35  ;;  %v877_v44 = vor.u32 %v940_v42, %v876_v41  ;;  %v941_v45 = vld [vmem:[%s1240_s3 + $0x10] sm:$0xf0]  ;;  %v939_v46 = vld [vmem:[%s1240_s3 + $0x4] sm:$0xf]  ;;  %v878_v47 = vld [vmem:[%s1240_s3 + $0xc] sm:$0xf0] }
 0x1c8   : > { %500 = vmatpush.bf16.msra.mxu2 %v897_v39  ;;  %486 = vmatpush.bf16.msra.mxu1 %v893_v40  ;;  %v885_v48 = vor.u32 %v941_v45, %v884_v43  ;;  %v881_v49 = vor.u32 %v939_v46, %v878_v47  ;;  %v938_v50 = vld [vmem:[#allocation2] sm:$0xff]  ;;  %vm462_vm2 = vcmask 261120   ;;  %v510_v52 = vand.u32 127, %v509_v51  ;;  %v526_v3 = vld [vmem:[#allocation3] sm:$0xff]  ;;  %v527_v8 = vld [vmem:[#allocation3 + $0x8] sm:$0xff] }
 0x1c9   : > { %v1048_v2 = vmov 0   ;;  %vm586_vm4 = vcmask 7168   ;;  %v544_v38 = vld [vmem:[#allocation4] sm:$0xff]  ;;  %v545_v43 = vld [vmem:[#allocation4 + $0x8] sm:$0xff] }
 0x1ca   : > { %v512_v53 = vadd.s32 256, %v510_v52  ;;  %996 = vset.pattern.permute.xlu1 %v1048_v2  ;;  %997 = vset.pattern.permute.xlu0 %v1048_v2 }
 0x1cb   : > { %473 = vmatpush.bf16.msra.mxu0 %v877_v44 }
 0x1cc   : > { %501 = vmatpush.bf16.msra.mxu2 %v885_v48  ;;  %487 = vmatpush.bf16.msra.mxu1 %v881_v49  ;;  %vm519_vm3 = vcmp.lt.s32.totalorder %v512_v53, 320 }
 0x1ce   : > { %898 = vmatmul.msk.bf16.vlgmr.msra.gmra.mxu0 %vm462_vm2, %v938_v50 }
 0x1cf   : > { %900 = vmatmul.msk.bf16.vlgmr.msra.gmra.mxu2 %vm462_vm2, %v938_v50  ;;  %899 = vmatmul.msk.bf16.vlgmr.msra.gmra.mxu1 %vm462_vm2, %v938_v50 }
 0x24b   : > { %v475_v54 = vpop.f32.mrf.mxu0 }
 0x24c   : > { %v489_v56 = vpop.f32.mrf.mxu1 }
 0x252   : > { %v503_v55 = vpop.f32.mrf.mxu2 }
 0x253   : > { %v522_v57 = vsel %vm519_vm3, %v503_v55, -1e+30  ;;  %v477_v61 = vpop.f32.mrf.mxu0 }
 0x254   : > { %v528_v58 = vmax.f32 %v475_v54, %v522_v57  ;;  %v491_v0 = vpop.f32.mrf.mxu1 }
 0x256   : > { %v529_v59 = vmax.f32 %v528_v58, %v489_v56 }
 0x258   : > { %530 = vmax.xlane.f32.xlu0 %v529_v59 }
 0x25a   : > { %v505_v60 = vpop.f32.mrf.mxu2 }
 0x25b   : > { %v525_v62 = vsel %vm519_vm3, %v505_v60, -1e+30 }
 0x25c   : > { %v532_v63 = vmax.f32 %v477_v61, %v525_v62 }
 0x25e   : > { %v533_v1 = vmax.f32 %v532_v63, %v491_v0 }
 0x260   : > { %534 = vmax.xlane.f32.xlu0 %v533_v1 }
 0x2cb   : > { %v531_v5 = vpop.xlane.xlu0 %530 }
 0x2cc   : > { %v536_v6 = vmax.f32 %v526_v3, %v531_v5 }
 0x2ce   : > { %v538_v7 = vsub.f32 %v526_v3, %v536_v6  ;;  %589 = vst.msk [vmem:[#allocation3] sm:$0xff] %vm586_vm4, %v536_v6  ;;  %550 = vperm.xlu1 %996, %v536_v6  }
 0x2d0   : > { %v540_v35 = vmul.f32 1.442695, %v538_v7 }
 0x2d3   : > { %v535_v9 = vpop.xlane.xlu0 %534 }
 0x2d4   : > { %v537_v10 = vmax.f32 %v527_v8, %v535_v9 }
 0x2d6   : > { %v539_v11 = vsub.f32 %v527_v8, %v537_v10  ;;  %590 = vst.msk [vmem:[#allocation3 + $0x8] sm:$0xff] %vm586_vm4, %v537_v10  ;;  %555 = vperm.xlu1 %996, %v537_v10  }
 0x2d8   : > { %v542_v36 = vmul.f32 1.442695, %v539_v11 }
 0x340   : > { %v551_v12 = vpop.permute.xlu1 %550 }
 0x341   : > { %v558_v13 = vsub.f32 %v475_v54, %v551_v12  ;;  %v559_v14 = vsub.f32 %v489_v56, %v551_v12  ;;  %v560_v15 = vsub.f32 %v522_v57, %v551_v12 }
 0x343   : > { %v564_v16 = vmul.f32 1.442695, %v558_v13  ;;  %v566_v17 = vmul.f32 1.442695, %v559_v14  ;;  %v568_v18 = vmul.f32 1.442695, %v560_v15 }
 0x345   : > { %998 = vpow2.f32 %v564_v16 }
 0x346   : > { %1000 = vpow2.f32 %v566_v17 }
 0x347   : > { %1002 = vpow2.f32 %v568_v18 }
 0x348   : > { %v556_v19 = vpop.permute.xlu1 %555 }
 0x349   : > { %v561_v20 = vsub.f32 %v477_v61, %v556_v19  ;;  %v562_v22 = vsub.f32 %v491_v0, %v556_v19  ;;  %v563_v23 = vsub.f32 %v525_v62, %v556_v19 }
 0x34b   : > { %v999_v24 = vpop.eup %998  ;;  %v570_v25 = vmul.f32 1.442695, %v561_v20  ;;  %v572_v27 = vmul.f32 1.442695, %v562_v22  ;;  %v574_v29 = vmul.f32 1.442695, %v563_v23 }
 0x34c   : > { %v1001_v28 = vpop.eup %1000 }
 0x34d   : > { %1004 = vpow2.f32 %v570_v25  ;;  %v576_v4 = vadd.f32 %v1001_v28, %v999_v24  ;;  %v1003_v21 = vpop.eup %1002 }
 0x34e   : > { %1006 = vpow2.f32 %v572_v27 }
 0x34f   : > { %v577_v30 = vadd.f32 %v1003_v21, %v576_v4  ;;  %1008 = vpow2.f32 %v574_v29 }
 0x350   : > { %1010 = vpow2.f32 %v540_v35 }
 0x351   : > { %578 = vadd.xlane.f32.xlu2 %v577_v30  ;;  %1012 = vpow2.f32 %v542_v36 }
 0x353   : > { %v1005_v31 = vpop.eup %1004 }
 0x354   : > { %v1007_v32 = vpop.eup %1006 }
 0x355   : > { %v580_v33 = vadd.f32 %v1007_v32, %v1005_v31  ;;  %v1009_v34 = vpop.eup %1008 }
 0x356   : > { %v1011_v37 = vpop.eup %1010 }
 0x357   : > { %v581_v26 = vadd.f32 %v1009_v34, %v580_v33  ;;  %v546_v39 = vmul.f32 %v1011_v37, %v544_v38  ;;  %v1013_v42 = vpop.eup %1012 }
 0x358   : > { %v547_v44 = vmul.f32 %v1013_v42, %v545_v43 }
 0x359   : > { %582 = vadd.xlane.f32.xlu2 %v581_v26 }
 0x3c4   : > { %v579_v40 = vpop.xlane.xlu2 %578 }
 0x3c5   : > { %v584_v41 = vadd.f32 %v579_v40, %v546_v39 }
 0x3c7   : > { %587 = vst.msk [vmem:[#allocation4] sm:$0xff] %vm586_vm4, %v584_v41 }
 0x3cc   : > { %v583_v45 = vpop.xlane.xlu2 %582 }
 0x3cd   : > { %v585_v46 = vadd.f32 %v583_v45, %v547_v44 }
 0x3cf   : > { %588 = vst.msk [vmem:[#allocation4 + $0x8] sm:$0xff] %vm586_vm4, %v585_v46 }
 0x3d0 PF: > { %p901_p6 = scmp.ne.s32.totalorder %s1034_s15, 1 }
 0x3d2   : > { %594 = sbr.rel (%p901_p6) target bundleno = 1140 (0x474), region = 48 }
 0x3d7   : > { %v920_v47 = vld [vmem:[%s1240_s3 + $0x18] sm:$0xf]  ;;  %v950_v48 = vld [vmem:[%s1240_s3 + $0x20] sm:$0xf0]  ;;  %v949_v49 = vld [vmem:[%s1240_s3 + $0x1c] sm:$0xf]  ;;  %v689_v12 = vlaneseq }
 0x3d8   : > { %v921_v50 = vor.u32 %v950_v48, %v920_v47  ;;  %v922_v51 = vld [vmem:[%s1240_s3 + $0x24] sm:$0xf0]  ;;  %v928_v52 = vld [vmem:[%s1240_s3 + $0x20] sm:$0xf]  ;;  %v951_v53 = vld [vmem:[%s1240_s3 + $0x28] sm:$0xf0] }
 0x3d9   : > { %v925_v54 = vor.u32 %v949_v49, %v922_v51  ;;  %v929_v55 = vor.u32 %v951_v53, %v928_v52  ;;  %v908_v56 = vld [vmem:[%s1240_s3] sm:$0xf]  ;;  %v947_v57 = vld [vmem:[%s1240_s3 + $0x8] sm:$0xf0]  ;;  %v946_v58 = vld [vmem:[%s1240_s3 + $0x4] sm:$0xf] }
 0x3da   : > { %652 = vmatpush.bf16.msra.mxu0 %v921_v50  ;;  %v909_v59 = vor.u32 %v947_v57, %v908_v56  ;;  %v910_v60 = vld [vmem:[%s1240_s3 + $0xc] sm:$0xf0]  ;;  %v916_v61 = vld [vmem:[%s1240_s3 + $0x8] sm:$0xf]  ;;  %v948_v62 = vld [vmem:[%s1240_s3 + $0x10] sm:$0xf0] }
 0x3db   : > { %666 = vmatpush.bf16.msra.mxu1 %v925_v54  ;;  %680 = vmatpush.bf16.msra.mxu2 %v929_v55  ;;  %v913_v63 = vor.u32 %v946_v58, %v910_v60  ;;  %v917_v0 = vor.u32 %v948_v62, %v916_v61  ;;  %v706_v1 = vld [vmem:[#allocation3] sm:$0xff]  ;;  %v724_v2 = vld [vmem:[#allocation4] sm:$0xff]  ;;  %v1049_v3 = vmov 0   ;;  %v945_v5 = vld [vmem:[#allocation2] sm:$0xff]  ;;  %vm642_vm5 = vcmask 261120  }
 0x3dc   : > { %1014 = vset.pattern.permute.xlu0 %v1049_v3  ;;  %1015 = vset.pattern.permute.xlu1 %v1049_v3  ;;  %1016 = vlog2.f32 %v724_v2  ;;  %v725_v6 = vld [vmem:[#allocation4 + $0x8] sm:$0xff]  ;;  %v707_v8 = vld [vmem:[#allocation3 + $0x8] sm:$0xff]  ;;  %v690_v14 = vand.u32 127, %v689_v12 }
 0x3dd   : > { %710 = vperm.xlu0 %1014, %v706_v1   ;;  %1018 = vlog2.f32 %v725_v6 }
 0x3de   : > { %653 = vmatpush.bf16.msra.mxu0 %v909_v59  ;;  %v692_v19 = vadd.s32 256, %v690_v14 }
 0x3df   : > { %667 = vmatpush.bf16.msra.mxu1 %v913_v63  ;;  %681 = vmatpush.bf16.msra.mxu2 %v917_v0 }
 0x3e0   : > { %vm699_vm6 = vcmp.lt.s32.totalorder %v692_v19, 320 }
 0x3e1   : > { %930 = vmatmul.msk.bf16.vlgmr.msra.gmra.mxu0 %vm642_vm5, %v945_v5 }
 0x3e2   : > { %v1017_v7 = vpop.eup %1016  ;;  %931 = vmatmul.msk.bf16.vlgmr.msra.gmra.mxu1 %vm642_vm5, %v945_v5  ;;  %932 = vmatmul.msk.bf16.vlgmr.msra.gmra.mxu2 %vm642_vm5, %v945_v5 }
 0x3e3   : > { %v727_v9 = vmul.f32 0.6931472, %v1017_v7  ;;  %v1019_v10 = vpop.eup %1018 }
 0x3e4   : > { %v729_v11 = vmul.f32 0.6931472, %v1019_v10 }
 0x3e5   : > { %732 = vperm.xlu1 %1015, %v727_v9   ;;  %715 = vperm.xlu0 %1014, %v707_v8  }
 0x3ed   : > { %737 = vperm.xlu1 %1015, %v729_v11  }
 0x44f   : > { %v711_v13 = vpop.permute.xlu0 %710 }
 0x457   : > { %v733_v15 = vpop.permute.xlu1 %732  ;;  %v716_v24 = vpop.permute.xlu0 %715 }
 0x45e   : > { %v655_v16 = vpop.f32.mrf.mxu0 }
 0x45f   : > { %v718_v17 = vsub.f32 %v655_v16, %v711_v13  ;;  %v669_v18 = vpop.f32.mrf.mxu1  ;;  %v738_v29 = vpop.permute.xlu1 %737 }
 0x460   : > { %v719_v20 = vsub.f32 %v669_v18, %v711_v13 }
 0x461   : > { %v740_v22 = vsub.f32 %v718_v17, %v733_v15 }
 0x462   : > { %v741_v23 = vsub.f32 %v719_v20, %v733_v15 }
 0x463   : > { %746 = vst [vmem:[%s1241_s4] sm:$0xff] %v740_v22 }
 0x464   : > { %747 = vst [vmem:[%s1241_s4 + $0x8] sm:$0xff] %v741_v23 }
 0x465   : > { %v683_v25 = vpop.f32.mrf.mxu2 }
 0x466   : > { %v702_v27 = vsel %vm699_vm6, %v683_v25, -1e+30  ;;  %v657_v28 = vpop.f32.mrf.mxu0 }
 0x467   : > { %v720_v4 = vsub.f32 %v702_v27, %v711_v13  ;;  %v721_v21 = vsub.f32 %v657_v28, %v716_v24  ;;  %v671_v30 = vpop.f32.mrf.mxu1 }
 0x468   : > { %v722_v31 = vsub.f32 %v671_v30, %v716_v24 }
 0x469   : > { %v742_v32 = vsub.f32 %v720_v4, %v733_v15  ;;  %v743_v33 = vsub.f32 %v721_v21, %v738_v29 }
 0x46a   : > { %v744_v34 = vsub.f32 %v722_v31, %v738_v29 }
 0x46b   : > { %748 = vst [vmem:[%s1241_s4 + $0x10] sm:$0xff] %v742_v32 }
 0x46c   : > { %749 = vst [vmem:[%s1241_s4 + $0x18] sm:$0xff] %v743_v33 }
 0x46d   : > { %750 = vst [vmem:[%s1241_s4 + $0x20] sm:$0xff] %v744_v34  ;;  %v685_v26 = vpop.f32.mrf.mxu2 }
 0x46e   : > { %v705_v35 = vsel %vm699_vm6, %v685_v26, -1e+30 }
 0x46f   : > { %v723_v36 = vsub.f32 %v705_v35, %v716_v24 }
 0x471   : > { %v745_v37 = vsub.f32 %v723_v36, %v738_v29 }
 0x473   : > { %751 = vst [vmem:[%s1241_s4 + $0x28] sm:$0xff] %v745_v37 }
 0x474 PF: > { %s14_s17 = sadd.s32 1, %s1042_s17   ;;  %s1242_s15 = smov %s1038_s16 }
 0x475   : > { %p11_p7 = scmp.ge.s32.totalorder %s14_s17, 4   ;;  %s1243_s16 = smov %s1245_s18 }
 0x477   :  { %13 = sbr.rel (!%p11_p7) target bundleno = 2 (0x2), region = 81 }

</bundles_post_ra>
